<compile_context>
chip_gen: v7x
topology: tpu7x:2x2x1
jax: 0.10.0
libtpu: 0.0.40
codegen_flags: <defaults>
</compile_context>

<pallas_src>
import jax
import jax.numpy as jnp
from jax import lax
from jax.experimental import pallas as pl
from jax.experimental.pallas import tpu as pltpu


def _round_up(n, m):
    return ((n + m - 1) // m) * m


def mlp_hook_kernel(x_ref, w1_ref, b1_ref, w2_ref, b2_ref, out_ref, hook_ref):
    x = x_ref[...]                      # (TB, D)
    w1 = w1_ref[...]                    # (H_pad, D)   PyTorch nn.Linear layout
    b1 = b1_ref[...]                    # (1, H_pad)
    w2 = w2_ref[...]                    # (C_pad, H_pad)
    b2 = b2_ref[...]                    # (1, C_pad)

    # fc1: contract x's D axis against w1's axis 1 (transpose folded into the
    # MXU op).  This pre-activation is what the forward hook captures.
    h = lax.dot_general(
        x, w1,
        dimension_numbers=(((1,), (1,)), ((), ())),
        preferred_element_type=jnp.float32,
    ) + b1
    hook_ref[...] = h.astype(hook_ref.dtype)

    # ReLU + fc2 -> final output (f32 accumulate, single downcast at the end).
    a = jnp.maximum(h, 0.0)
    y = lax.dot_general(
        a.astype(w2.dtype), w2,
        dimension_numbers=(((1,), (1,)), ((), ())),
        preferred_element_type=jnp.float32,
    ) + b2
    out_ref[...] = y.astype(out_ref.dtype)


def model_with_hook_forward(x, w1, b1, w2, b2, *, batch_tile=512):
    """Returns (out, selected_out) exactly like ModelWithHookAuto.forward.

    x : (B, D_in)
    w1: (H, D_in)  b1: (H,)     -- PyTorch nn.Linear layout (kept as-is)
    w2: (C, H)     b2: (C,)
    """
    B, D = x.shape
    H = w1.shape[0]
    C = w2.shape[0]
    dtype = x.dtype
    itemsize = jnp.dtype(dtype).itemsize

    # Lane-dense padding of the hook / output feature dims; sublane-aligned batch.
    H_pad = _round_up(H, 128)
    C_pad = _round_up(C, 128)
    B_pad = _round_up(B, 8)
    TB = _round_up(min(batch_tile, B_pad), 8)
    B_pad = _round_up(B_pad, TB)
    grid_b = B_pad // TB

    x_p = x if B_pad == B else jnp.pad(x, ((0, B_pad - B), (0, 0)))
    w1_p = jnp.pad(w1, ((0, H_pad - H), (0, 0)))            # (H_pad, D)
    b1_p = jnp.pad(b1, (0, H_pad - H)).reshape(1, H_pad)
    w2_p = jnp.pad(w2, ((0, C_pad - C), (0, H_pad - H)))    # (C_pad, H_pad)
    b2_p = jnp.pad(b2, (0, C_pad - C)).reshape(1, C_pad)

    # VMEM budget: double-buffered batch tiles + (double-buffered) resident params,
    # clamped to the v7x 64 MiB physical ceiling.
    tile_bytes = 2 * TB * (D + H_pad + C_pad) * itemsize
    param_bytes = 2 * (H_pad * D + C_pad * H_pad + H_pad + C_pad) * itemsize
    vmem_limit = min(64 * 1024 * 1024,
                     max(tile_bytes + param_bytes + (4 << 20), 16 << 20))

    out_shapes = (
        jax.ShapeDtypeStruct((B_pad, C_pad), dtype),   # model output (padded)
        jax.ShapeDtypeStruct((B_pad, H_pad), dtype),   # hooked fc1 output (padded)
    )

    fn = pl.pallas_call(
        mlp_hook_kernel,
        out_shape=out_shapes,
        grid=(grid_b,),
        in_specs=[
            pl.BlockSpec((TB, D), lambda i: (i, 0)),          # x: tiled over batch
            pl.BlockSpec((H_pad, D), lambda i: (0, 0)),       # w1: resident
            pl.BlockSpec((1, H_pad), lambda i: (0, 0)),       # b1: resident
            pl.BlockSpec((C_pad, H_pad), lambda i: (0, 0)),   # w2: resident
            pl.BlockSpec((1, C_pad), lambda i: (0, 0)),       # b2: resident
        ],
        out_specs=(
            pl.BlockSpec((TB, C_pad), lambda i: (i, 0)),
            pl.BlockSpec((TB, H_pad), lambda i: (i, 0)),
        ),
        compiler_params=pltpu.CompilerParams(
            dimension_semantics=("parallel",),   # batch axis shards across v7x's 2 TCs
            vmem_limit_bytes=int(vmem_limit),
        ),
    )
    out_p, hook_p = fn(x_p, w1_p, b1_p, w2_p, b2_p)
    # Strip the lane/batch padding outside the kernel.
    return out_p[:B, :C], hook_p[:B, :H]


def reference_forward(x, w1, b1, w2, b2):
    h = x @ w1.T + b1
    out = jnp.maximum(h, 0.0) @ w2.T + b2
    return out, h


if __name__ == "__main__":
    # Small shapes consistent with an MLP forward: batch=8, in=32, hidden=64, out=16.
    B, D, H, C = 8, 32, 64, 16

    key = jax.random.PRNGKey(0)
    kx, k1, k2, k3, k4 = jax.random.split(key, 5)

    x = jax.random.normal(kx, (B, D), dtype=jnp.float32)

    # Deterministic parameter init (PyTorch Linear-style uniform bounds).
    bound1 = 1.0 / (D ** 0.5)
    bound2 = 1.0 / (H ** 0.5)
    w1 = jax.random.uniform(k1, (H, D), minval=-bound1, maxval=bound1, dtype=jnp.float32)
    b1 = jax.random.uniform(k2, (H,),  minval=-bound1, maxval=bound1, dtype=jnp.float32)
    w2 = jax.random.uniform(k3, (C, H), minval=-bound2, maxval=bound2, dtype=jnp.float32)
    b2 = jax.random.uniform(k4, (C,),  minval=-bound2, maxval=bound2, dtype=jnp.float32)

    out, selected_out = model_with_hook_forward(x, w1, b1, w2, b2)
    jax.block_until_ready(out)
    jax.block_until_ready(selected_out)

    ref_out, ref_hook = reference_forward(x, w1, b1, w2, b2)
    assert out.shape == (B, C) and selected_out.shape == (B, H)
    assert jnp.allclose(out, ref_out, atol=1e-5, rtol=1e-5)
    assert jnp.allclose(selected_out, ref_hook, atol=1e-5, rtol=1e-5)

    print("KERNEL_OK")
</pallas_src>

<mosaic_0001>
module attributes {stable_mosaic.version = 11 : i64} {
  func.func @mlp_hook_kernel(%arg0: i32, %arg1: memref<8x32xf32, #tpu.memory_space<vmem>>, %arg2: memref<128x32xf32, #tpu.memory_space<vmem>>, %arg3: memref<1x128xf32, #tpu.memory_space<vmem>>, %arg4: memref<128x128xf32, #tpu.memory_space<vmem>>, %arg5: memref<1x128xf32, #tpu.memory_space<vmem>>, %arg6: memref<8x128xf32, #tpu.memory_space<vmem>>, %arg7: memref<8x128xf32, #tpu.memory_space<vmem>>) attributes {dimension_semantics = [#tpu.dimension_semantics<parallel>], iteration_bounds = array<i64: 1>, scalar_prefetch = 0 : i64, scratch_operands = 0 : i64, tpu.core_type = #tpu.core_type<tc>, window_params = [{transform_indices = @transform_0, window_bounds = array<i64: 8, 32>}, {pipeline_mode = #tpu.pipeline_mode<synchronous>, transform_indices = @transform_1, window_bounds = array<i64: 128, 32>}, {pipeline_mode = #tpu.pipeline_mode<synchronous>, transform_indices = @transform_2, window_bounds = array<i64: 1, 128>}, {pipeline_mode = #tpu.pipeline_mode<synchronous>, transform_indices = @transform_3, window_bounds = array<i64: 128, 128>}, {pipeline_mode = #tpu.pipeline_mode<synchronous>, transform_indices = @transform_4, window_bounds = array<i64: 1, 128>}, {transform_indices = @transform_5, window_bounds = array<i64: 8, 128>}, {transform_indices = @transform_6, window_bounds = array<i64: 8, 128>}]} {
    %c0 = arith.constant 0 : index
    %c0_0 = arith.constant 0 : index
    %0 = vector.load %arg1[%c0, %c0_0] : memref<8x32xf32, #tpu.memory_space<vmem>>, vector<8x32xf32>
    %c0_1 = arith.constant 0 : index
    %c0_2 = arith.constant 0 : index
    %1 = vector.load %arg2[%c0_1, %c0_2] : memref<128x32xf32, #tpu.memory_space<vmem>>, vector<128x32xf32>
    %c0_3 = arith.constant 0 : index
    %c0_4 = arith.constant 0 : index
    %2 = vector.load %arg3[%c0_3, %c0_4] : memref<1x128xf32, #tpu.memory_space<vmem>>, vector<1x128xf32>
    %c0_5 = arith.constant 0 : index
    %c0_6 = arith.constant 0 : index
    %3 = vector.load %arg4[%c0_5, %c0_6] : memref<128x128xf32, #tpu.memory_space<vmem>>, vector<128x128xf32>
    %c0_7 = arith.constant 0 : index
    %c0_8 = arith.constant 0 : index
    %4 = vector.load %arg5[%c0_7, %c0_8] : memref<1x128xf32, #tpu.memory_space<vmem>>, vector<1x128xf32>
    %cst = arith.constant dense<0.000000e+00> : vector<8x128xf32>
    %5 = tpu.matmul %0, %1, %cst {dimension_numbers = #tpu.dot_dimension_numbers<[1], [1], [0], [0], [0, 0, 1, 0], [], []>} : vector<8x32xf32>, vector<128x32xf32>, vector<8x128xf32> -> vector<8x128xf32>
    %6 = vector.broadcast %2 : vector<1x128xf32> to vector<8x128xf32>
    %7 = arith.addf %5, %6 : vector<8x128xf32>
    %c0_9 = arith.constant 0 : index
    %c0_10 = arith.constant 0 : index
    %8 = vector.load %arg7[%c0_9, %c0_10] : memref<8x128xf32, #tpu.memory_space<vmem>>, vector<8x128xf32>
    tpu.vector_store %arg7[%c0_9, %c0_10], %7 {strides = array<i32>} : memref<8x128xf32, #tpu.memory_space<vmem>>, vector<8x128xf32>,
    %cst_11 = arith.constant 0.000000e+00 : f32
    %9 = vector.broadcast %cst_11 : f32 to vector<8x128xf32>
    %10 = arith.maximumf %7, %9 : vector<8x128xf32>
    %cst_12 = arith.constant dense<0.000000e+00> : vector<8x128xf32>
    %11 = tpu.matmul %10, %3, %cst_12 {dimension_numbers = #tpu.dot_dimension_numbers<[1], [1], [0], [0], [0, 0, 1, 0], [], []>} : vector<8x128xf32>, vector<128x128xf32>, vector<8x128xf32> -> vector<8x128xf32>
    %12 = vector.broadcast %4 : vector<1x128xf32> to vector<8x128xf32>
    %13 = arith.addf %11, %12 : vector<8x128xf32>
    %c0_13 = arith.constant 0 : index
    %c0_14 = arith.constant 0 : index
    %14 = vector.load %arg6[%c0_13, %c0_14] : memref<8x128xf32, #tpu.memory_space<vmem>>, vector<8x128xf32>
    tpu.vector_store %arg6[%c0_13, %c0_14], %13 {strides = array<i32>} : memref<8x128xf32, #tpu.memory_space<vmem>>, vector<8x128xf32>,
    return
  }
  func.func @transform_0(%arg0: i32) -> (i32, i32) {
    %c0_i32 = arith.constant 0 : i32
    %c0_i32_0 = arith.constant 0 : i32
    return %arg0, %c0_i32 : i32, i32
  }
  func.func @transform_1(%arg0: i32) -> (i32, i32) {
    %c0_i32 = arith.constant 0 : i32
    %c0_i32_0 = arith.constant 0 : i32
    %c0_i32_1 = arith.constant 0 : i32
    return %c0_i32, %c0_i32_0 : i32, i32
  }
  func.func @transform_2(%arg0: i32) -> (i32, i32) {
    %c0_i32 = arith.constant 0 : i32
    %c0_i32_0 = arith.constant 0 : i32
    %c0_i32_1 = arith.constant 0 : i32
    return %c0_i32, %c0_i32_0 : i32, i32
  }
  func.func @transform_3(%arg0: i32) -> (i32, i32) {
    %c0_i32 = arith.constant 0 : i32
    %c0_i32_0 = arith.constant 0 : i32
    %c0_i32_1 = arith.constant 0 : i32
    return %c0_i32, %c0_i32_0 : i32, i32
  }
  func.func @transform_4(%arg0: i32) -> (i32, i32) {
    %c0_i32 = arith.constant 0 : i32
    %c0_i32_0 = arith.constant 0 : i32
    %c0_i32_1 = arith.constant 0 : i32
    return %c0_i32, %c0_i32_0 : i32, i32
  }
  func.func @transform_5(%arg0: i32) -> (i32, i32) {
    %c0_i32 = arith.constant 0 : i32
    %c0_i32_0 = arith.constant 0 : i32
    return %arg0, %c0_i32 : i32, i32
  }
  func.func @transform_6(%arg0: i32) -> (i32, i32) {
    %c0_i32 = arith.constant 0 : i32
    %c0_i32_0 = arith.constant 0 : i32
    return %arg0, %c0_i32 : i32, i32
  }
}

</mosaic_0001>

<bundles_post_ra>
// kernel: tpu_custom_call.1
= control target key start
LH: loop header
LB: loop body
LE: loop exit
PB: predicated region body
PF: predicated region fallthrough
CT: control target
= control target key end

     0   :  { %12 = vsyncpa [#allocation3], 0  ;;  %vm65_vm0 = vcmask 261120   ;;  %v526_v2 = vmov 0.0|0.0   ;;  %vm527_vm2 = vmmov 0   ;;  %v528_v5 = vmov 0.0   ;;  %s734_s0 = inlined_call_operand.vmem [shape: f32[8,32], index: 0, kind: input, shape index: {}]   ;;  %s735_s1 = inlined_call_operand.vmem [shape: f32[128,32], index: 1, kind: input, shape index: {}]   ;;  %s736_s2 = inlined_call_operand.vmem [shape: f32[1,128], index: 2, kind: input, shape index: {}]   ;;  %s737_s3 = inlined_call_operand.vmem [shape: f32[128,128], index: 3, kind: input, shape index: {}]   ;;  %s738_s4 = inlined_call_operand.vmem [shape: f32[1,128], index: 4, kind: input, shape index: {}]   ;;  %s739_s5 = inlined_call_operand.hbm [shape: f32[8,128], index: 5, kind: output, shape index: {0}]   ;;  %s740_s6 = inlined_call_operand.hbm [shape: f32[8,128], index: 6, kind: output, shape index: {1}]  }
   0x1   :  { %v25_v0 = vld [vmem:[%s735_s1] sm:$0xff]  ;;  %v26_v1 = vld [vmem:[%s735_s1 + $0x8] sm:$0xff]  ;;  %417 = vmatprep.subr.bf16.mxu0 %v526_v2  ;;  %vm575_vm1 = vmpackc.low %vm65_vm0, %vm65_vm0  ;;  %449 = vmatprep.subr.bf16.mxu1 %v526_v2 }
   0x2   :  { %v418_v3 = vpack.c.bf16 %v26_v1, %v25_v0  ;;  %379 = vmatprep.mubr.msk.f32.mxu0 %vm527_vm2, %v528_v5  ;;  %414 = vmatprep.mubr.msk.f32.mxu1 %vm527_vm2, %v528_v5  ;;  %v27_v6 = vld [vmem:[%s735_s1 + $0x10] sm:$0xff]  ;;  %v28_v7 = vld [vmem:[%s735_s1 + $0x18] sm:$0xff]  ;;  %v42_v8 = vld [vmem:[%s737_s3] sm:$0xff] }
   0x3   :  { %v43_v9 = vld [vmem:[%s737_s3 + $0x8] sm:$0xff]  ;;  %v422_v10 = vpack.c.bf16 %v28_v7, %v27_v6  ;;  %v44_v12 = vld [vmem:[%s737_s3 + $0x10] sm:$0xff]  ;;  %v45_v13 = vld [vmem:[%s737_s3 + $0x18] sm:$0xff] }
   0x4   :  { %420 = vmatpush3.bf16.xpose.msk.msra.mxu0 %vm575_vm1, %v418_v3  ;;  %v450_v11 = vpack.c.bf16 %v43_v9, %v42_v8 }
   0x5   :  { %421 = vmatprep.subr.bf16.mxu0 %v526_v2 }
   0x6   :  { %451 = vmatpush3.bf16.xpose.msra.mxu1 %v450_v11 }
   0x7   :  { %452 = vmatprep.subr.bf16.mxu1 %v526_v2 }
   0xc   :  { %424 = vmatpush3.bf16.xpose.msk.msra.mxu0 %vm575_vm1, %v422_v10 }
   0xd   :  { %13 = vsyncpa [#allocation5], 0  ;;  %425 = vmatprep.subr.bf16.mxu0 %v526_v2  ;;  %v29_v14 = vld [vmem:[%s735_s1 + $0x20] sm:$0xff]  ;;  %v30_v15 = vld [vmem:[%s735_s1 + $0x28] sm:$0xff]  ;;  %v453_v16 = vpack.c.bf16 %v45_v13, %v44_v12 }
   0xe   :  { %v426_v17 = vpack.c.bf16 %v30_v15, %v29_v14  ;;  %v46_v18 = vld [vmem:[%s737_s3 + $0x20] sm:$0xff]  ;;  %v47_v19 = vld [vmem:[%s737_s3 + $0x28] sm:$0xff]  ;;  %v31_v20 = vld [vmem:[%s735_s1 + $0x30] sm:$0xff] }
   0xf   :  { %454 = vmatpush3.bf16.xpose.msra.mxu1 %v453_v16  ;;  %v32_v21 = vld [vmem:[%s735_s1 + $0x38] sm:$0xff]  ;;  %v456_v22 = vpack.c.bf16 %v47_v19, %v46_v18  ;;  %v48_v24 = vld [vmem:[%s737_s3 + $0x30] sm:$0xff]  ;;  %v33_v26 = vld [vmem:[%s735_s1 + $0x40] sm:$0xff] }
  0x10   :  { %455 = vmatprep.subr.bf16.mxu1 %v526_v2  ;;  %v430_v23 = vpack.c.bf16 %v32_v21, %v31_v20  ;;  %v49_v25 = vld [vmem:[%s737_s3 + $0x38] sm:$0xff]  ;;  %v34_v27 = vld [vmem:[%s735_s1 + $0x48] sm:$0xff]  ;;  %v50_v30 = vld [vmem:[%s737_s3 + $0x40] sm:$0xff] }
  0x11   :  { %v459_v28 = vpack.c.bf16 %v49_v25, %v48_v24  ;;  %v434_v29 = vpack.c.bf16 %v34_v27, %v33_v26  ;;  %v51_v31 = vld [vmem:[%s737_s3 + $0x48] sm:$0xff]  ;;  %v35_v32 = vld [vmem:[%s735_s1 + $0x50] sm:$0xff]  ;;  %v36_v33 = vld [vmem:[%s735_s1 + $0x58] sm:$0xff] }
  0x12   :  { %v462_v34 = vpack.c.bf16 %v51_v31, %v50_v30  ;;  %v438_v35 = vpack.c.bf16 %v36_v33, %v35_v32  ;;  %v52_v36 = vld [vmem:[%s737_s3 + $0x50] sm:$0xff]  ;;  %v53_v37 = vld [vmem:[%s737_s3 + $0x58] sm:$0xff]  ;;  %v37_v38 = vld [vmem:[%s735_s1 + $0x60] sm:$0xff] }
  0x13   :  { %v38_v39 = vld [vmem:[%s735_s1 + $0x68] sm:$0xff]  ;;  %v465_v40 = vpack.c.bf16 %v53_v37, %v52_v36  ;;  %v54_v42 = vld [vmem:[%s737_s3 + $0x60] sm:$0xff]  ;;  %v39_v44 = vld [vmem:[%s735_s1 + $0x70] sm:$0xff] }
  0x14   :  { %428 = vmatpush3.bf16.xpose.msk.msra.mxu0 %vm575_vm1, %v426_v17  ;;  %v442_v41 = vpack.c.bf16 %v38_v39, %v37_v38  ;;  %v55_v43 = vld [vmem:[%s737_s3 + $0x68] sm:$0xff]  ;;  %v40_v45 = vld [vmem:[%s735_s1 + $0x78] sm:$0xff]  ;;  %v56_v48 = vld [vmem:[%s737_s3 + $0x70] sm:$0xff] }
  0x15   :  { %429 = vmatprep.subr.bf16.mxu0 %v526_v2  ;;  %v468_v46 = vpack.c.bf16 %v55_v43, %v54_v42  ;;  %v446_v47 = vpack.c.bf16 %v40_v45, %v39_v44  ;;  %v57_v49 = vld [vmem:[%s737_s3 + $0x78] sm:$0xff]  ;;  %v24_v51 = vld [vmem:[%s734_s0] sm:$0xff]  ;;  %s529_s3 = smov [#allocation4]  }
  0x16   :  { %v471_v50 = vpack.c.bf16 %v57_v49, %v56_v48  ;;  %v294_v52 = vld [vmem:[%s736_s2] ss:$0 sm:$0xff]  ;;  %s282_s16 = sshll.u32 %s529_s3, 4  ;;  %s283_s16 = int_to_ptr.vmem [resolvable:$true] %s282_s16 }
  0x17   :  { %457 = vmatpush3.bf16.xpose.msra.mxu1 %v456_v22  ;;  %s478_s17 = scalar_lea.vmem %s283_s16, 128  ;;  %p483_p1 = scmp.lt.s32.totalorder %s283_s16, %s283_s16 }
  0x18   :  { %458 = vmatprep.subr.bf16.mxu1 %v526_v2  ;;  %p479_p0 = scmp.ne.s32.totalorder %s283_s16, %s478_s17  ;;  %p484_p2 = scmp.lt.s32.totalorder %s478_s17, %s478_s17 }
  0x1a   :  { %p485_p3 = por %p484_p2, %p483_p1 }
  0x1c   :  { %432 = vmatpush3.bf16.xpose.msk.msra.mxu0 %vm575_vm1, %v430_v23  ;;  %p486_p4 = pnand %p485_p3, %p479_p0 }
  0x1d   :  { %433 = vmatprep.subr.bf16.mxu0 %v526_v2 }
  0x1f   :  { %460 = vmatpush3.bf16.xpose.msra.mxu1 %v459_v28 }
  0x20   :  { %461 = vmatprep.subr.bf16.mxu1 %v526_v2 }
  0x24   :  { %436 = vmatpush3.bf16.xpose.msk.msra.mxu0 %vm575_vm1, %v434_v29 }
  0x25   :  { %437 = vmatprep.subr.bf16.mxu0 %v526_v2 }
  0x27   :  { %463 = vmatpush3.bf16.xpose.msra.mxu1 %v462_v34 }
  0x28   :  { %464 = vmatprep.subr.bf16.mxu1 %v526_v2 }
  0x2c   :  { %440 = vmatpush3.bf16.xpose.msk.msra.mxu0 %vm575_vm1, %v438_v35 }
  0x2d   :  { %441 = vmatprep.subr.bf16.mxu0 %v526_v2 }
  0x2f   :  { %466 = vmatpush3.bf16.xpose.msra.mxu1 %v465_v40 }
  0x30   :  { %467 = vmatprep.subr.bf16.mxu1 %v526_v2 }
  0x34   :  { %444 = vmatpush3.bf16.xpose.msk.msra.mxu0 %vm575_vm1, %v442_v41 }
  0x35   :  { %445 = vmatprep.subr.bf16.mxu0 %v526_v2 }
  0x37   :  { %469 = vmatpush3.bf16.xpose.msra.mxu1 %v468_v46 }
  0x38   :  { %470 = vmatprep.subr.bf16.mxu1 %v526_v2 }
  0x3c   :  { %448 = vmatpush3.bf16.xpose.msk.msra.mxu0 %vm575_vm1, %v446_v47 }
  0x3f   :  { %472 = vmatpush3.bf16.xpose.msra.mxu1 %v471_v50 }
  0x43   :  { %380 = vmatmul.mubr.msk.f32.vlgmr.msra.gmra.mrb[0].mxu0 %vm65_vm0, %v24_v51 }
 0x116   :  { %v183_v53 = vpop.f32.mrb[0].mxu0 }
 0x117   :  { %v184_v54 = vadd.f32 %v294_v52, %v183_v53  ;;  %v381_v55 = vpop.f32.mrb[1].mxu0 }
 0x119   :  { %v188_v56 = vmax.f32 %v184_v54, 0.0  ;;  %187 = vst [vmem:[#allocation4] sm:$0xff] %v184_v54 }
 0x11b   :  { %415 = vmatmul.mubr.f32.vlgmr.msra.gmra.mrb[0].mxu1 %v188_v56 }
 0x11c   :  { %489 = shalt.err (!%p486_p4)
}
 0x11d   :  { %s490_s2 = scalar_lea.hbm %s740_s6, 128 }
 0x11e   :  { %p491_p5 = scmp.ne.s32.totalorder %s740_s6, %s490_s2  ;;  %p494_p6 = scmp.lt.u32.totalorder %s490_s2, %s740_s6 }
 0x120   :  { %p496_p7 = pnand %p494_p6, %p491_p5 }
 0x122   :  { %499 = shalt.err (!%p496_p7)
}
 0x123   :  { %285 = dma.vmem_to_hbm [thread:$0]  %s283_s16, 128, %s740_s6, [#allocation5]   ;;  %v312_v57 = vld [vmem:[%s738_s4] ss:$0 sm:$0xff] }
 0x124   :  { %s530_s27 = smov [#allocation2]  }
 0x125   :  { %s272_s28 = sshll.u32 %s530_s27, 4  ;;  %s273_s28 = int_to_ptr.vmem [resolvable:$true] %s272_s28 }
 0x126   :  { %s500_s29 = scalar_lea.vmem %s273_s28, 128  ;;  %p505_p9 = scmp.lt.s32.totalorder %s273_s28, %s273_s28 }
 0x127   :  { %p501_p8 = scmp.ne.s32.totalorder %s273_s28, %s500_s29  ;;  %p506_p10 = scmp.lt.s32.totalorder %s500_s29, %s500_s29 }
 0x129   :  { %p507_p11 = por %p506_p10, %p505_p9 }
 0x12b   :  { %p508_p12 = pnand %p507_p11, %p501_p8 }
 0x1ee   :  { %v261_v58 = vpop.f32.mrb[0].mxu1 }
 0x1ef   :  { %v262_v59 = vadd.f32 %v312_v57, %v261_v58  ;;  %v416_v60 = vpop.f32.mrb[1].mxu1 }
 0x1f1   :  { %265 = vst [vmem:[#allocation2] sm:$0xff] %v262_v59 }
 0x1f2   :  { %511 = shalt.err (!%p508_p12)
}
 0x1f3   :  { %s512_s7 = scalar_lea.hbm %s739_s5, 128 }
 0x1f4   :  { %p513_p13 = scmp.ne.s32.totalorder %s739_s5, %s512_s7  ;;  %p516_p0 = scmp.lt.u32.totalorder %s512_s7, %s739_s5 }
 0x1f6   :  { %p518_p1 = pnand %p516_p0, %p513_p13 }
 0x1f8   :  { %521 = shalt.err (!%p518_p1)
}
 0x1f9   :  { %275 = dma.vmem_to_hbm [thread:$0]  %s273_s28, 128, %s739_s5, [#allocation3]  }
 0x1fa   :  { %522 = dma.done.wait [#allocation3], 128  }
 0x1fb   :  { %523 = vsyncadd [#allocation3], 4294967168 }
 0x1fc   :  { %524 = dma.done.wait [#allocation5], 128  }
 0x1fd   :  { %525 = vsyncadd [#allocation5], 4294967168 }
 0x1fe   :  { %292 = vsyncpa [#allocation3], 1 }
 0x1ff   :  { %293 = vsyncpa [#allocation5], 1 }

</bundles_post_ra>
